<compile_context>
chip_gen: v5e
topology: v5e:2x2
jax: 0.10.0
libtpu: 0.0.40
codegen_flags: <defaults>
</compile_context>

<pallas_src>
import math
import functools

import jax
import jax.numpy as jnp
from jax.experimental import pallas as pl
from jax.experimental.pallas import tpu as pltpu


def _leaky(v, slope=0.2):
    return jnp.where(v > 0, v, slope * v)


def _tree_gcn_kernel(x_ref, wcat_ref, w1_ref, w2_ref, b_ref, o_ref, *,
                     degree, in_feat, out_feat, has_branch, activation):
    # x_ref   : (tm, in_feat)                       compute dtype (f32 or bf16)
    # wcat_ref: (in_feat, out_feat [+ degree*in_feat])  [W_root | W_branch] fused
    # w1_ref  : (in_feat, in_feat*support)
    # w2_ref  : (in_feat*support, out_feat)
    # b_ref   : (1, out_feat) f32
    # o_ref   : (tm, degree*out_feat)
    x = x_ref[...]

    # One fused MXU matmul producing [root | branch_0 | ... | branch_{degree-1}].
    xcat = jnp.dot(x, wcat_ref[...], preferred_element_type=jnp.float32)
    root = xcat[:, :out_feat]                       # (tm, out_feat), f32
    bias = b_ref[...].astype(jnp.float32)           # (1, out_feat)

    outs = []
    for d in range(degree):                         # static, unrolled (degree small)
        if has_branch:
            lo = out_feat + d * in_feat             # static lane slice of xcat
            branch = xcat[:, lo:lo + in_feat].astype(x.dtype)
        else:
            branch = x                              # non-upsample: no identity matmul
        h = jnp.dot(branch, w1_ref[...], preferred_element_type=jnp.float32)
        h = _leaky(h).astype(x.dtype)
        h = jnp.dot(h, w2_ref[...], preferred_element_type=jnp.float32)
        out = root + h + bias
        if activation:
            out = _leaky(out)
        outs.append(out)

    packed = outs[0] if len(outs) == 1 else jnp.concatenate(outs, axis=-1)
    o_ref[...] = packed.astype(o_ref.dtype)         # single lane-dense full-tile store


def _pick_tile(bn, cap=512):
    """Largest multiple-of-8 divisor of bn that is <= cap, preferring >= 2 tiles
    (so megacore / v7x's second TensorCore has work)."""
    cands = [t for t in range(8, min(bn, cap) + 1, 8) if bn % t == 0]
    if not cands:
        return bn                                   # full-array block (always legal)
    multi = [t for t in cands if bn // t >= 2]
    return max(multi) if multi else max(cands)


def tree_gcn_layer(x, params, *, degree, upsample=True, activation=True,
                   tm=None, compute_dtype=jnp.float32):
    """Pallas implementation of TreeGCNLayer.forward.

    x:      (B, old_num, in_feat)
    params: dict with pre-transposed weights:
        W_root   (in_feat, out_feat)
        W_branch (in_feat, in_feat*degree)   [used only if upsample and degree > 1]
        W_loop1  (in_feat, in_feat*support)
        W_loop2  (in_feat*support, out_feat)
        bias     (1, out_feat)
    returns (B, old_num*degree, out_feat) if upsampling else (B, old_num, out_feat)
    """
    B, old_num, in_feat = x.shape
    wr, w1, w2, bias = params["W_root"], params["W_loop1"], params["W_loop2"], params["bias"]
    out_feat = wr.shape[1]
    hid = w1.shape[1]
    out_dtype = x.dtype

    has_branch = bool(upsample and degree > 1)
    eff_degree = degree if has_branch else 1

    # Fuse the x-side matmuls: [W_root | W_branch] -> one MXU push with a wider N.
    wcat = jnp.concatenate([wr, params["W_branch"]], axis=1) if has_branch else wr
    ncat = wcat.shape[1]

    x2d = x.reshape(B * old_num, in_feat).astype(compute_dtype)
    wcat = wcat.astype(compute_dtype)
    w1c = w1.astype(compute_dtype)
    w2c = w2.astype(compute_dtype)
    bias_f32 = bias.astype(jnp.float32)

    BN = B * old_num
    if tm is None:
        tm = _pick_tile(BN)
    assert BN % tm == 0 and (tm % 8 == 0 or tm == BN), \
        "node tile must divide B*old_num and be a multiple of 8 (or the full extent)"

    out_cols = eff_degree * out_feat

    itemsize = jnp.dtype(compute_dtype).itemsize
    flops = 2 * BN * in_feat * ncat + 2 * BN * eff_degree * (in_feat * hid + hid * out_feat)
    bytes_accessed = int(
        (BN * in_feat + in_feat * ncat + in_feat * hid + hid * out_feat) * itemsize
        + out_feat * 4 + BN * out_cols * jnp.dtype(out_dtype).itemsize)
    cost = pl.CostEstimate(flops=flops, transcendentals=0, bytes_accessed=bytes_accessed)

    out2d = pl.pallas_call(
        functools.partial(_tree_gcn_kernel, degree=eff_degree, in_feat=in_feat,
                          out_feat=out_feat, has_branch=has_branch, activation=activation),
        out_shape=jax.ShapeDtypeStruct((BN, out_cols), out_dtype),
        grid_spec=pltpu.PrefetchScalarGridSpec(
            num_scalar_prefetch=0,
            grid=(BN // tm,),
            in_specs=[
                pl.BlockSpec((tm, in_feat), lambda i: (i, 0)),        # x tile
                pl.BlockSpec((in_feat, ncat), lambda i: (0, 0)),      # [W_root | W_branch]
                pl.BlockSpec((in_feat, hid), lambda i: (0, 0)),       # W_loop1
                pl.BlockSpec((hid, out_feat), lambda i: (0, 0)),      # W_loop2
                pl.BlockSpec((1, out_feat), lambda i: (0, 0)),        # bias
            ],
            out_specs=pl.BlockSpec((tm, out_cols), lambda i: (i, 0)),
        ),
        compiler_params=pltpu.CompilerParams(
            dimension_semantics=("parallel",),
        ),
        cost_estimate=cost,
    )(x2d, wcat, w1c, w2c, bias_f32)

    # (BN, degree*out_feat) -> (B, old_num*degree, out_feat): free contiguous view,
    # child d of node i ends up at row i*degree + d, exactly like PyTorch.
    return out2d.reshape(B, old_num * eff_degree, out_feat)


def tree_gcn_reference(x, params, *, degree, upsample=True, activation=True):
    """Plain-JAX reference mirroring the PyTorch forward exactly (f32)."""
    B, old_num, in_feat = x.shape
    wr, w1, w2, b = params["W_root"], params["W_loop1"], params["W_loop2"], params["bias"]

    def w_loop(z):
        h = z @ w1
        h = jnp.where(h > 0, h, 0.2 * h)
        return h @ w2

    root = x @ wr
    if upsample and degree > 1:
        branch = (x @ params["W_branch"]).reshape(B, old_num * degree, in_feat)
        branch = w_loop(branch)
        root = jnp.repeat(root, degree, axis=1)
        combined = root + branch
    else:
        combined = root + w_loop(x)
    out = combined + b
    if activation:
        out = jnp.where(out > 0, out, 0.2 * out)
    return out


def init_params(key, in_feat, out_feat, degree, support):
    """Deterministic synthetic init (uniform +/- 1/sqrt(fan_in), like nn.Linear)."""
    ks = jax.random.split(key, 5)

    def lin(k, fan_in, fan_out):
        bound = 1.0 / math.sqrt(fan_in)
        return jax.random.uniform(k, (fan_in, fan_out), jnp.float32, -bound, bound)

    return {
        "W_root": lin(ks[0], in_feat, out_feat),
        "W_branch": lin(ks[1], in_feat, in_feat * degree),
        "W_loop1": lin(ks[2], in_feat, in_feat * support),
        "W_loop2": lin(ks[3], in_feat * support, out_feat),
        "bias": jax.random.uniform(
            ks[4], (1, out_feat), jnp.float32,
            -1.0 / math.sqrt(out_feat), 1.0 / math.sqrt(out_feat)),
    }


if __name__ == "__main__":
    B, old_num, in_feat, out_feat = 2, 8, 32, 32
    degree, support = 2, 10

    key = jax.random.PRNGKey(0)
    kx, kp = jax.random.split(key)
    x = jax.random.normal(kx, (B, old_num, in_feat), jnp.float32)
    params = init_params(kp, in_feat, out_feat, degree, support)

    # --- f32 path, upsampling (degree > 1) -------------------------------------
    y = tree_gcn_layer(x, params, degree=degree, upsample=True, activation=True)
    y = jax.block_until_ready(y)
    y_ref = tree_gcn_reference(x, params, degree=degree, upsample=True, activation=True)
    assert y.shape == (B, old_num * degree, out_feat)
    assert jnp.allclose(y, y_ref, atol=1e-4, rtol=1e-4), "upsample path mismatch"

    # --- f32 path, non-upsampling (degree == 1): combined = root + W_loop(x) ---
    y1 = tree_gcn_layer(x, params, degree=1, upsample=False, activation=True)
    y1 = jax.block_until_ready(y1)
    y1_ref = tree_gcn_reference(x, params, degree=1, upsample=False, activation=True)
    assert y1.shape == (B, old_num, out_feat)
    assert jnp.allclose(y1, y1_ref, atol=1e-4, rtol=1e-4), "non-upsample path mismatch"

    # --- bf16 MXU path (f32 accumulation), loose tolerance vs f32 reference ----
    yb = tree_gcn_layer(x, params, degree=degree, upsample=True, activation=True,
                        compute_dtype=jnp.bfloat16)
    yb = jax.block_until_ready(yb)
    assert jnp.allclose(yb, y_ref, atol=0.1, rtol=0.1), "bf16 path mismatch"

    print("KERNEL_OK")
</pallas_src>

<mosaic_0001>
module attributes {stable_mosaic.version = 11 : i64} {
  func.func @_tree_gcn_kernel(%arg0: i32, %arg1: memref<8x32xf32, #tpu.memory_space<vmem>>, %arg2: memref<32x96xf32, #tpu.memory_space<vmem>>, %arg3: memref<32x320xf32, #tpu.memory_space<vmem>>, %arg4: memref<320x32xf32, #tpu.memory_space<vmem>>, %arg5: memref<1x32xf32, #tpu.memory_space<vmem>>, %arg6: memref<8x64xf32, #tpu.memory_space<vmem>>) attributes {dimension_semantics = [#tpu.dimension_semantics<parallel>], iteration_bounds = array<i64: 2>, scalar_prefetch = 0 : i64, scratch_operands = 0 : i64, tpu.core_type = #tpu.core_type<tc>, window_params = [{transform_indices = @transform_0, window_bounds = array<i64: 8, 32>}, {pipeline_mode = #tpu.pipeline_mode<synchronous>, transform_indices = @transform_1, window_bounds = array<i64: 32, 96>}, {pipeline_mode = #tpu.pipeline_mode<synchronous>, transform_indices = @transform_2, window_bounds = array<i64: 32, 320>}, {pipeline_mode = #tpu.pipeline_mode<synchronous>, transform_indices = @transform_3, window_bounds = array<i64: 320, 32>}, {pipeline_mode = #tpu.pipeline_mode<synchronous>, transform_indices = @transform_4, window_bounds = array<i64: 1, 32>}, {transform_indices = @transform_5, window_bounds = array<i64: 8, 64>}]} {
    %c0 = arith.constant 0 : index
    %c0_0 = arith.constant 0 : index
    %0 = vector.load %arg1[%c0, %c0_0] : memref<8x32xf32, #tpu.memory_space<vmem>>, vector<8x32xf32>
    %c0_1 = arith.constant 0 : index
    %c0_2 = arith.constant 0 : index
    %1 = vector.load %arg2[%c0_1, %c0_2] : memref<32x96xf32, #tpu.memory_space<vmem>>, vector<32x96xf32>
    %cst = arith.constant dense<0.000000e+00> : vector<8x96xf32>
    %2 = tpu.matmul %0, %1, %cst {dimension_numbers = #tpu.dot_dimension_numbers<[1], [0], [0], [1], [0, 0, 1, 1], [], []>} : vector<8x32xf32>, vector<32x96xf32>, vector<8x96xf32> -> vector<8x96xf32>
    %3 = vector.extract_strided_slice %2 {offsets = [0, 0], sizes = [8, 32], strides = [1, 1]} : vector<8x96xf32> to vector<8x32xf32>
    %c0_3 = arith.constant 0 : index
    %c0_4 = arith.constant 0 : index
    %4 = vector.load %arg5[%c0_3, %c0_4] : memref<1x32xf32, #tpu.memory_space<vmem>>, vector<1x32xf32>
    %5 = vector.extract_strided_slice %2 {offsets = [0, 32], sizes = [8, 32], strides = [1, 1]} : vector<8x96xf32> to vector<8x32xf32>
    %c0_5 = arith.constant 0 : index
    %c0_6 = arith.constant 0 : index
    %6 = vector.load %arg3[%c0_5, %c0_6] : memref<32x320xf32, #tpu.memory_space<vmem>>, vector<32x320xf32>
    %cst_7 = arith.constant dense<0.000000e+00> : vector<8x320xf32>
    %7 = tpu.matmul %5, %6, %cst_7 {dimension_numbers = #tpu.dot_dimension_numbers<[1], [0], [0], [1], [0, 0, 1, 1], [], []>} : vector<8x32xf32>, vector<32x320xf32>, vector<8x320xf32> -> vector<8x320xf32>
    %cst_8 = arith.constant 0.000000e+00 : f32
    %8 = vector.broadcast %cst_8 : f32 to vector<8x320xf32>
    %9 = arith.cmpf ogt, %7, %8 : vector<8x320xf32>
    %cst_9 = arith.constant 2.000000e-01 : f32
    %10 = vector.broadcast %cst_9 : f32 to vector<8x320xf32>
    %11 = arith.mulf %10, %7 : vector<8x320xf32>
    %12 = arith.select %9, %7, %11 : vector<8x320xi1>, vector<8x320xf32>
    %c0_10 = arith.constant 0 : index
    %c0_11 = arith.constant 0 : index
    %13 = vector.load %arg4[%c0_10, %c0_11] : memref<320x32xf32, #tpu.memory_space<vmem>>, vector<320x32xf32>
    %cst_12 = arith.constant dense<0.000000e+00> : vector<8x32xf32>
    %14 = tpu.matmul %12, %13, %cst_12 {dimension_numbers = #tpu.dot_dimension_numbers<[1], [0], [0], [1], [0, 0, 1, 1], [], []>} : vector<8x320xf32>, vector<320x32xf32>, vector<8x32xf32> -> vector<8x32xf32>
    %15 = arith.addf %3, %14 : vector<8x32xf32>
    %16 = vector.broadcast %4 : vector<1x32xf32> to vector<8x32xf32>
    %17 = arith.addf %15, %16 : vector<8x32xf32>
    %cst_13 = arith.constant 0.000000e+00 : f32
    %18 = vector.broadcast %cst_13 : f32 to vector<8x32xf32>
    %19 = arith.cmpf ogt, %17, %18 : vector<8x32xf32>
    %cst_14 = arith.constant 2.000000e-01 : f32
    %20 = vector.broadcast %cst_14 : f32 to vector<8x32xf32>
    %21 = arith.mulf %20, %17 : vector<8x32xf32>
    %22 = arith.select %19, %17, %21 : vector<8x32xi1>, vector<8x32xf32>
    %23 = vector.extract_strided_slice %2 {offsets = [0, 64], sizes = [8, 32], strides = [1, 1]} : vector<8x96xf32> to vector<8x32xf32>
    %c0_15 = arith.constant 0 : index
    %c0_16 = arith.constant 0 : index
    %24 = vector.load %arg3[%c0_15, %c0_16] : memref<32x320xf32, #tpu.memory_space<vmem>>, vector<32x320xf32>
    %cst_17 = arith.constant dense<0.000000e+00> : vector<8x320xf32>
    %25 = tpu.matmul %23, %24, %cst_17 {dimension_numbers = #tpu.dot_dimension_numbers<[1], [0], [0], [1], [0, 0, 1, 1], [], []>} : vector<8x32xf32>, vector<32x320xf32>, vector<8x320xf32> -> vector<8x320xf32>
    %cst_18 = arith.constant 0.000000e+00 : f32
    %26 = vector.broadcast %cst_18 : f32 to vector<8x320xf32>
    %27 = arith.cmpf ogt, %25, %26 : vector<8x320xf32>
    %cst_19 = arith.constant 2.000000e-01 : f32
    %28 = vector.broadcast %cst_19 : f32 to vector<8x320xf32>
    %29 = arith.mulf %28, %25 : vector<8x320xf32>
    %30 = arith.select %27, %25, %29 : vector<8x320xi1>, vector<8x320xf32>
    %c0_20 = arith.constant 0 : index
    %c0_21 = arith.constant 0 : index
    %31 = vector.load %arg4[%c0_20, %c0_21] : memref<320x32xf32, #tpu.memory_space<vmem>>, vector<320x32xf32>
    %cst_22 = arith.constant dense<0.000000e+00> : vector<8x32xf32>
    %32 = tpu.matmul %30, %31, %cst_22 {dimension_numbers = #tpu.dot_dimension_numbers<[1], [0], [0], [1], [0, 0, 1, 1], [], []>} : vector<8x320xf32>, vector<320x32xf32>, vector<8x32xf32> -> vector<8x32xf32>
    %33 = arith.addf %3, %32 : vector<8x32xf32>
    %34 = vector.broadcast %4 : vector<1x32xf32> to vector<8x32xf32>
    %35 = arith.addf %33, %34 : vector<8x32xf32>
    %cst_23 = arith.constant 0.000000e+00 : f32
    %36 = vector.broadcast %cst_23 : f32 to vector<8x32xf32>
    %37 = arith.cmpf ogt, %35, %36 : vector<8x32xf32>
    %cst_24 = arith.constant 2.000000e-01 : f32
    %38 = vector.broadcast %cst_24 : f32 to vector<8x32xf32>
    %39 = arith.mulf %38, %35 : vector<8x32xf32>
    %40 = arith.select %37, %35, %39 : vector<8x32xi1>, vector<8x32xf32>
    %41 = tpu.concatenate %22, %40 in 1 : vector<8x32xf32>, vector<8x32xf32> -> vector<8x64xf32>
    %c0_25 = arith.constant 0 : index
    %c0_26 = arith.constant 0 : index
    %42 = vector.load %arg6[%c0_25, %c0_26] : memref<8x64xf32, #tpu.memory_space<vmem>>, vector<8x64xf32>
    tpu.vector_store %arg6[%c0_25, %c0_26], %41 {strides = array<i32>} : memref<8x64xf32, #tpu.memory_space<vmem>>, vector<8x64xf32>,
    return
  }
  func.func @transform_0(%arg0: i32) -> (i32, i32) {
    %c0_i32 = arith.constant 0 : i32
    %c0_i32_0 = arith.constant 0 : i32
    return %arg0, %c0_i32 : i32, i32
  }
  func.func @transform_1(%arg0: i32) -> (i32, i32) {
    %c0_i32 = arith.constant 0 : i32
    %c0_i32_0 = arith.constant 0 : i32
    %c0_i32_1 = arith.constant 0 : i32
    return %c0_i32, %c0_i32_0 : i32, i32
  }
  func.func @transform_2(%arg0: i32) -> (i32, i32) {
    %c0_i32 = arith.constant 0 : i32
    %c0_i32_0 = arith.constant 0 : i32
    %c0_i32_1 = arith.constant 0 : i32
    return %c0_i32, %c0_i32_0 : i32, i32
  }
  func.func @transform_3(%arg0: i32) -> (i32, i32) {
    %c0_i32 = arith.constant 0 : i32
    %c0_i32_0 = arith.constant 0 : i32
    %c0_i32_1 = arith.constant 0 : i32
    return %c0_i32, %c0_i32_0 : i32, i32
  }
  func.func @transform_4(%arg0: i32) -> (i32, i32) {
    %c0_i32 = arith.constant 0 : i32
    %c0_i32_0 = arith.constant 0 : i32
    %c0_i32_1 = arith.constant 0 : i32
    return %c0_i32, %c0_i32_0 : i32, i32
  }
  func.func @transform_5(%arg0: i32) -> (i32, i32) {
    %c0_i32 = arith.constant 0 : i32
    %c0_i32_0 = arith.constant 0 : i32
    return %arg0, %c0_i32 : i32, i32
  }
}

</mosaic_0001>

<bundles_post_ra>
// kernel: tpu_custom_call.1
= control target key start
LH: loop header
LB: loop body
LE: loop exit
PB: predicated region body
PF: predicated region fallthrough
CT: control target
= control target key end

     0   :  { %10 = vsyncpa [#allocation3], 0  ;;  %s1191_s0 = inlined_call_operand.vmem [shape: f32[16,32], index: 0, kind: input, shape index: {}]   ;;  %s1192_s1 = inlined_call_operand.vmem [shape: f32[32,96], index: 1, kind: input, shape index: {}]   ;;  %s1193_s2 = inlined_call_operand.vmem [shape: f32[32,320], index: 2, kind: input, shape index: {}]   ;;  %s1194_s3 = inlined_call_operand.vmem [shape: f32[320,32], index: 3, kind: input, shape index: {}]   ;;  %s1195_s4 = inlined_call_operand.vmem [shape: f32[1,32], index: 4, kind: input, shape index: {}]   ;;  %s1196_s5 = inlined_call_operand.hbm [shape: f32[16,64], index: 5, kind: output, shape index: {}]  }
   0x1   :  { %12 = vsyncpa [#allocation3 + $0x1], 0  ;;  %s829_s18 = smov 0   ;;  %s831_s19 = smov 0  }
   0x2   :  { %s833_s20 = smov 0   ;;  %s835_s21 = smov 0  }
   0x3 LB: > { %s850_s22 = sadd.s32 4294967295, %s794_s21   ;;  %s670_s23 = sadd.s32 4294967294, %s794_s21   ;;  %s794_s21 = sphi %s835_s21, %s1202_s21   ;;  %s790_s20 = sphi %s833_s20, %s1201_s20   ;;  %s786_s19 = sphi %s831_s19, %s1200_s19   ;;  %s782_s18 = sphi %s829_s18, %s1199_s18  }
   0x4   : > { %s854_s24 = sadd.s32 1, %s794_s21   ;;  %s135_s25 = sadd.s32 1, %s790_s20 }
   0x5   : > { %s132_s26 = ssub.s32 %s794_s21, %s854_s24  ;;  %p145_p0 = scmp.ne.s32.totalorder %s790_s20, %s786_s19 }
   0x6   : > { %p133_p1 = scmp.eq.s32.totalorder %s132_s26, 0  ;;  %p146_p2 = scmp.eq.s32.totalorder %s850_s22, 1 }
   0x7   : > { %p151_p3 = scmp.ne.s32.totalorder %s786_s19, %s782_s18  ;;  %p152_p4 = scmp.eq.s32.totalorder %s670_s23, 1 }
   0x8   : > { %s865_s27 = scalar_select %p133_p1, %s790_s20, %s135_s25  }
   0x9   : > { %p867_p5 = por %p146_p2, %p145_p0  ;;  %p871_p6 = por %p152_p4, %p151_p3 }
   0xa   : > { %p673_p7 = scmp.ge.s32.totalorder %s794_s21, 1  ;;  %p189_p8 = scmp.lt.s32.totalorder %s794_s21, 3 }
   0xc   : > { %p190_p9 = pnand %p673_p7, %p189_p8 }
   0xd   : > { %p216_p10 = scmp.lt.s32.totalorder (!%p190_p9), %s850_s22, 1  ;;  %s796_s23 = smov (!%p190_p9), 96  }
   0xe   : > { %193 = sbr.rel (%p190_p9) target bundleno = 800 (0x320), region = 40  ;;  %s797_s25 = smov (!%p190_p9), 64  }
   0xf   : > { %s213_s15 = sand.u32 (!%p190_p9), 1, %s786_s19   ;;  %s752_s12 = scalar_lea.hbm (!%p190_p9), %s1196_s5, 16 }
  0x10   : > { %s674_s16 = sshll.u32 (!%p190_p9), %s213_s15, 3 }
  0x11   : > { %s215_s30 = scalar_lea.vmem (!%p190_p9), [#allocation2], %s674_s16 }
  0x12   : > { %s608_s6 = sshll.u32 (!%p190_p9), %s215_s30, 4  ;;  %s609_s6 = int_to_ptr.vmem [resolvable:$true] %s608_s6 }
  0x13   : > { %v224_v0 = vld [vmem:[%s1192_s1 + $0x18] sm:$0xff]  ;;  %v223_v1 = vld [vmem:[%s1192_s1 + $0x10] sm:$0xff]  ;;  %v222_v2 = vld [vmem:[%s1192_s1 + $0x8] sm:$0xff]  ;;  %s217_s11 = scalar_select %p216_p10, %s850_s22, 1  ;;  %vm225_vm0 = vcmask 261120   ;;  %vm376_vm3 = vcmask 523264  }
  0x14   : > { %241 = vmatpush.msra.mxu0 %v224_v0  ;;  %v221_v3 = vld [vmem:[%s1192_s1] sm:$0xff]  ;;  %v259_v5 = vld [vmem:[%s1193_s2 + $0x48] sm:$0xff]  ;;  %v901_v6 = vld [vmem:[%s1193_s2 + $0x58] sm:$0xff] }
  0x15   : > { %s675_s14 = sshll.u32 %s217_s11, 3  ;;  %v256_v7 = vld [vmem:[%s1193_s2 + $0x30] sm:$0xff]  ;;  %279 = vmatpush.msra.mxu1 %v259_v5  ;;  %319 = vmatpush.msra.mxu3 %v901_v6  ;;  %v910_v8 = vld [vmem:[%s1193_s2 + $0x40] sm:$0xff]  ;;  %v253_v9 = vld [vmem:[%s1193_s2 + $0x18] sm:$0xff] }
  0x16   : > { %242 = vmatpush.msra.mxu0 %v223_v1  ;;  %s219_s17 = scalar_lea.vmem %s1191_s0, %s675_s14  ;;  %v918_v10 = vld [vmem:[%s1193_s2 + $0x28] sm:$0xff]  ;;  %v250_v11 = vld [vmem:[%s1193_s2] sm:$0xff]  ;;  %v927_v12 = vld [vmem:[%s1193_s2 + $0x10] sm:$0xff]  ;;  %s798_s14 = smov 32  }
  0x17   : > { %v220_v4 = vld [vmem:[%s219_s17] sm:$0xff]  ;;  %280 = vmatpush.msra.mxu1 %v256_v7  ;;  %320 = vmatpush.msra.mxu3 %v910_v8  ;;  %v260_v14 = vld [vmem:[%s1193_s2 + $0x50] sm:$0xff]  ;;  %v257_v15 = vld [vmem:[%s1193_s2 + $0x38] sm:$0xff]  ;;  %s686_s17 = sshll.u32 %s850_s22, 3  ;;  %s596_s22 = scalar_lea.sflag [#allocation3], %s213_s15 }
  0x18   : > { %243 = vmatpush.msra.mxu0 %v222_v2  ;;  %v254_v16 = vld [vmem:[%s1193_s2 + $0x20] sm:$0xff]  ;;  %v251_v17 = vld [vmem:[%s1193_s2 + $0x8] sm:$0xff]  ;;  %v351_v18 = vld [vmem:[%s1194_s3 + $0x78] sm:$0xff]  ;;  %s606_s26 = scalar_lea.hbm %s1196_s5, %s686_s17 }
  0x19   : > { %281 = vmatpush.msra.mxu1 %v253_v9  ;;  %321 = vmatpush.msra.mxu3 %v918_v10  ;;  %v350_v19 = vld [vmem:[%s1194_s3 + $0x70] sm:$0xff]  ;;  %v349_v20 = vld [vmem:[%s1194_s3 + $0x68] sm:$0xff]  ;;  %v959_v21 = vld [vmem:[%s1194_s3 + $0x60] sm:$0xff]  ;;  %s610_s7 = sshll.u32 %s606_s26, 4  ;;  %s611_s7 = int_to_ptr.hbm [resolvable:$true] %s610_s7 }
  0x1a   : > { %244 = vmatpush.msra.mxu0 %v221_v3  ;;  %v964_v22 = vld [vmem:[%s1194_s3 + $0x138] sm:$0xff]  ;;  %v970_v23 = vld [vmem:[%s1194_s3 + $0x130] sm:$0xff]  ;;  %v978_v25 = vld [vmem:[%s1194_s3 + $0x128] sm:$0xff]  ;;  %s746_s8 = sshra.s32 %s611_s7, 4  ;;  %s747_s8 = int_to_ptr.hbm [resolvable:$true] %s746_s8 }
  0x1b   : > { %676 = vmatmul.msk.f32.vlgmr.msra.gmra.mxu0 %vm225_vm0, %v220_v4  ;;  %282 = vmatpush.msra.mxu1 %v250_v11  ;;  %v347_v24 = vld [vmem:[%s1194_s3 + $0x58] sm:$0xff]  ;;  %v346_v26 = vld [vmem:[%s1194_s3 + $0x50] sm:$0xff]  ;;  %v988_v27 = vld [vmem:[%s1194_s3 + $0x120] sm:$0xff]  ;;  %s748_s9 = scalar_lea.hbm %s747_s8, 8  ;;  %p753_p0 = scmp.lt.s32.totalorder %s747_s8, %s1196_s5 }
  0x1c   : > { %322 = vmatpush.msra.mxu3 %v927_v12  ;;  %380 = vmatpush.msrb.mxu0 %v351_v18  ;;  %v345_v28 = vld [vmem:[%s1194_s3 + $0x48] sm:$0xff]  ;;  %v997_v29 = vld [vmem:[%s1194_s3 + $0x118] sm:$0xff]  ;;  %v344_v30 = vld [vmem:[%s1194_s3 + $0x40] sm:$0xff]  ;;  %p749_p11 = scmp.ne.s32.totalorder %s747_s8, %s748_s9  ;;  %p754_p1 = scmp.lt.s32.totalorder %s752_s12, %s748_s9 }
  0x1d   : > { %299 = vmatpush.msrb.mxu1 %v260_v14  ;;  %428 = vmatpush.msra.mxu2 %v964_v22  ;;  %v1006_v31 = vld [vmem:[%s1194_s3 + $0x110] sm:$0xff]  ;;  %v1012_v32 = vld [vmem:[%s1194_s3 + $0xf8] sm:$0xff]  ;;  %v1032_v37 = vld [vmem:[%s1194_s3 + $0xe8] sm:$0xff] }
  0x1e   : > { %464 = vmatpush.msrb.mxu3 %v259_v5  ;;  %381 = vmatpush.msrb.mxu0 %v350_v19  ;;  %v343_v34 = vld [vmem:[%s1194_s3 + $0x38] sm:$0xff]  ;;  %v1023_v35 = vld [vmem:[%s1194_s3 + $0xf0] sm:$0xff]  ;;  %v341_v38 = vld [vmem:[%s1194_s3 + $0x28] sm:$0xff]  ;;  %p750_p12 = pnand %p749_p11, %p867_p5  ;;  %p755_p2 = por %p754_p1, %p753_p0 }
  0x1f   : > { %300 = vmatpush.msrb.mxu1 %v257_v15  ;;  %429 = vmatpush.msra.mxu2 %v970_v23  ;;  %v342_v36 = vld [vmem:[%s1194_s3 + $0x30] sm:$0xff]  ;;  %v1041_v39 = vld [vmem:[%s1194_s3 + $0xe0] sm:$0xff]  ;;  %v1047_v40 = vld [vmem:[%s1194_s3 + $0xd8] sm:$0xff] }
  0x20   : > { %465 = vmatpush.msrb.mxu3 %v256_v7  ;;  %382 = vmatpush.msrb.mxu0 %v349_v20  ;;  %v340_v42 = vld [vmem:[%s1194_s3 + $0x20] sm:$0xff]  ;;  %v1061_v43 = vld [vmem:[%s1194_s3 + $0xd0] sm:$0xff]  ;;  %v339_v44 = vld [vmem:[%s1194_s3 + $0x18] sm:$0xff]  ;;  %p751_p13 = pneg %p750_p12 }
  0x21   : > { %301 = vmatpush.msrb.mxu1 %v254_v16  ;;  %430 = vmatpush.msra.mxu2 %v978_v25  ;;  %v1070_v45 = vld [vmem:[%s1194_s3 + $0xc8] sm:$0xff]  ;;  %v338_v46 = vld [vmem:[%s1194_s3 + $0x10] sm:$0xff]  ;;  %v1079_v47 = vld [vmem:[%s1194_s3 + $0xc0] sm:$0xff] }
  0x22   : > { %466 = vmatpush.msrb.mxu3 %v253_v9  ;;  %383 = vmatpush.msrb.mxu0 %v959_v21  ;;  %v1085_v48 = vld [vmem:[%s1194_s3 + $0xb8] sm:$0xff]  ;;  %v1094_v49 = vld [vmem:[%s1194_s3 + $0xb0] sm:$0xff]  ;;  %v369_v50 = vld [vmem:[%s1194_s3 + $0x108] sm:$0xff]  ;;  %p756_p3 = pnand %p755_p2, %p751_p13 }
  0x23   : > { %302 = vmatpush.msrb.mxu1 %v251_v17  ;;  %431 = vmatpush.msra.mxu2 %v988_v27  ;;  %v337_v51 = vld [vmem:[%s1194_s3 + $0x8] sm:$0xff]  ;;  %v368_v53 = vld [vmem:[%s1194_s3 + $0x100] sm:$0xff]  ;;  %v355_v56 = vld [vmem:[%s1194_s3 + $0x98] sm:$0xff] }
  0x24   : > { %467 = vmatpush.msrb.mxu3 %v250_v11  ;;  %384 = vmatpush.msrb.mxu0 %v347_v24  ;;  %v357_v52 = vld [vmem:[%s1194_s3 + $0xa8] sm:$0xff]  ;;  %v336_v54 = vld [vmem:[%s1194_s3] sm:$0xff]  ;;  %v354_v57 = vld [vmem:[%s1194_s3 + $0x90] sm:$0xff] }
  0x25   : > { %432 = vmatpush.msra.mxu2 %v997_v29  ;;  %v356_v55 = vld [vmem:[%s1194_s3 + $0xa0] sm:$0xff]  ;;  %v353_v58 = vld [vmem:[%s1194_s3 + $0x88] sm:$0xff] }
  0x26   : > { %385 = vmatpush.msrb.mxu0 %v346_v26  ;;  %v352_v59 = vld [vmem:[%s1194_s3 + $0x80] sm:$0xff] }
  0x27   : > { %433 = vmatpush.msra.mxu2 %v1006_v31 }
  0x28   : > { %386 = vmatpush.msrb.mxu0 %v345_v28 }
  0x29   : > { %434 = vmatpush.msra.mxu2 %v369_v50 }
  0x2a   : > { %387 = vmatpush.msrb.mxu0 %v344_v30 }
  0x2b   : > { %435 = vmatpush.msra.mxu2 %v368_v53 }
  0x2c   : > { %388 = vmatpush.msrb.mxu0 %v343_v34 }
  0x2d   : > { %504 = vmatpush.msrb.mxu2 %v901_v6 }
  0x2e   : > { %389 = vmatpush.msrb.mxu0 %v342_v36 }
  0x2f   : > { %505 = vmatpush.msrb.mxu2 %v910_v8 }
  0x30   : > { %390 = vmatpush.msrb.mxu0 %v341_v38 }
  0x31   : > { %506 = vmatpush.msrb.mxu2 %v918_v10 }
  0x32   : > { %391 = vmatpush.msrb.mxu0 %v340_v42 }
  0x33   : > { %507 = vmatpush.msrb.mxu2 %v927_v12 }
  0x34   : > { %392 = vmatpush.msrb.mxu0 %v339_v44 }
  0x36   : > { %393 = vmatpush.msrb.mxu0 %v338_v46 }
  0x38   : > { %394 = vmatpush.msrb.mxu0 %v337_v51 }
  0x3a   : > { %395 = vmatpush.msrb.mxu0 %v336_v54 }
  0x3c   : > { %572 = vmatpush.msra.mxu0 %v964_v22  ;;  %v731_v22 = vld [vmem:[%s1195_s4] ss:$0 sm:$0xff] }
  0x3e   : > { %573 = vmatpush.msra.mxu0 %v970_v23 }
  0x40   : > { %574 = vmatpush.msra.mxu0 %v978_v25 }
  0x42   : > { %575 = vmatpush.msra.mxu0 %v988_v27 }
  0x44   : > { %576 = vmatpush.msra.mxu0 %v997_v29 }
  0x46   : > { %577 = vmatpush.msra.mxu0 %v1006_v31 }
  0x48   : > { %578 = vmatpush.msra.mxu0 %v369_v50 }
  0x4a   : > { %579 = vmatpush.msra.mxu0 %v368_v53 }
  0x98   : > { %v931_v13 = vpop.f32.mrf.mxu0 }
  0x99   : > { %263 = vrot.lane.b32.xlu0 %v931_v13, %s796_s23 }
  0xa1   : > { %448 = vrot.lane.b32.xlu0 %v931_v13, %s797_s25 }
 0x10b   : > { %v264_v33 = vpop.permute.xlu0 %263 }
 0x10c   : > { %677 = vmatmul.msk.f32.vlgmr.msra.gmra.mxu1 %vm225_vm0, %v264_v33  ;;  %679 = vmatmul.msk.f32.vlgmr.msra.gmra.mxu3 %vm225_vm0, %v264_v33 }
 0x10d   : > { %484 = vmatpush.msra.mxu3 %v260_v14  ;;  %400 = vmatpush.msra.mxu1 %v1012_v32 }
 0x10f   : > { %485 = vmatpush.msra.mxu3 %v257_v15  ;;  %401 = vmatpush.msra.mxu1 %v1023_v35 }
 0x111   : > { %486 = vmatpush.msra.mxu3 %v254_v16  ;;  %402 = vmatpush.msra.mxu1 %v1032_v37 }
 0x113   : > { %v1049_v41 = vpop.permute.xlu0 %448  ;;  %487 = vmatpush.msra.mxu3 %v251_v17  ;;  %403 = vmatpush.msra.mxu1 %v1041_v39 }
 0x114   : > { %678 = vmatmul.msk.f32.vlgmr.msrb.gmra.mxu1 %vm225_vm0, %v264_v33  ;;  %681 = vmatmul.msk.f32.vlgmr.msrb.gmra.mxu3 %vm225_vm0, %v1049_v41 }
 0x115   : > { %524 = vmatpush.msrb.mxu3 %v351_v18  ;;  %404 = vmatpush.msra.mxu1 %v1047_v40 }
 0x117   : > { %525 = vmatpush.msrb.mxu3 %v350_v19  ;;  %405 = vmatpush.msra.mxu1 %v1061_v43 }
 0x119   : > { %526 = vmatpush.msrb.mxu3 %v349_v20  ;;  %406 = vmatpush.msra.mxu1 %v1070_v45 }
 0x11b   : > { %527 = vmatpush.msrb.mxu3 %v959_v21  ;;  %407 = vmatpush.msra.mxu1 %v1079_v47 }
 0x11c   : > { %682 = vmatmul.msk.f32.vlgmr.msra.gmra.mxu3 %vm225_vm0, %v1049_v41 }
 0x11d   : > { %528 = vmatpush.msrb.mxu3 %v347_v24  ;;  %408 = vmatpush.msra.mxu1 %v1085_v48 }
 0x11f   : > { %529 = vmatpush.msrb.mxu3 %v346_v26  ;;  %409 = vmatpush.msra.mxu1 %v1094_v49 }
 0x121   : > { %530 = vmatpush.msrb.mxu3 %v345_v28  ;;  %410 = vmatpush.msra.mxu1 %v357_v52 }
 0x123   : > { %531 = vmatpush.msrb.mxu3 %v344_v30  ;;  %411 = vmatpush.msra.mxu1 %v356_v55 }
 0x125   : > { %532 = vmatpush.msrb.mxu3 %v343_v34  ;;  %412 = vmatpush.msra.mxu1 %v355_v56 }
 0x127   : > { %533 = vmatpush.msrb.mxu3 %v342_v36  ;;  %413 = vmatpush.msra.mxu1 %v354_v57 }
 0x129   : > { %534 = vmatpush.msrb.mxu3 %v341_v38  ;;  %414 = vmatpush.msra.mxu1 %v353_v58 }
 0x12b   : > { %535 = vmatpush.msrb.mxu3 %v340_v42  ;;  %415 = vmatpush.msra.mxu1 %v352_v59 }
 0x12d   : > { %536 = vmatpush.msrb.mxu3 %v339_v44 }
 0x12f   : > { %537 = vmatpush.msrb.mxu3 %v338_v46 }
 0x131   : > { %538 = vmatpush.msrb.mxu3 %v337_v51 }
 0x133   : > { %539 = vmatpush.msrb.mxu3 %v336_v54 }
 0x189   : > { %v284_v60 = vpop.f32.mrf.mxu1 }
 0x18a   : > { %vm327_vm1 = vcmp.gt.f32.partialorder %v284_v60, 0.0  ;;  %v330_v61 = vmul.f32 0.2, %v284_v60 }
 0x18c   : > { %v333_v62 = vsel %vm327_vm1, %v284_v60, %v330_v61 }
 0x18d   : > { %396 = vmatmul.f32.vlgmr.msrb.gmra.mxu0 %v333_v62 }
 0x18f   : > { %v324_v63 = vpop.f32.mrf.mxu3 }
 0x190   : > { %vm329_vm2 = vcmp.gt.f32.partialorder %v324_v63, 0.0  ;;  %v332_v0 = vmul.f32 0.2, %v324_v63 }
 0x191   : > { %v304_v1 = vpop.f32.mrf.mxu1 }
 0x192   : > { %vm328_vm4 = vcmp.gt.f32.partialorder %v304_v1, 0.0  ;;  %v331_v2 = vmul.f32 0.2, %v304_v1  ;;  %v335_v3 = vsel %vm329_vm2, %v324_v63, %v332_v0 }
 0x193   : > { %680 = vmatmul.msk.f32.vlgmr.msra.gmra.mxu2 %vm376_vm3, %v335_v3 }
 0x194   : > { %544 = vmatpush.msra.mxu2 %v1012_v32  ;;  %v334_v4 = vsel %vm328_vm4, %v304_v1, %v331_v2 }
 0x195   : > { %416 = vmatmul.f32.vlgmr.msra.gmra.mxu1 %v334_v4 }
 0x196   : > { %545 = vmatpush.msra.mxu2 %v1023_v35 }
 0x197   : > { %v469_v5 = vpop.f32.mrf.mxu3 }
 0x198   : > { %vm512_vm5 = vcmp.gt.f32.partialorder %v469_v5, 0.0  ;;  %v515_v6 = vmul.f32 0.2, %v469_v5  ;;  %546 = vmatpush.msra.mxu2 %v1032_v37 }
 0x19a   : > { %547 = vmatpush.msra.mxu2 %v1041_v39  ;;  %v518_v7 = vsel %vm512_vm5, %v469_v5, %v515_v6 }
 0x19b   : > { %683 = vmatmul.msk.f32.vlgmr.msrb.gmra.mxu2 %vm225_vm0, %v1049_v41  ;;  %540 = vmatmul.f32.vlgmr.msrb.gmra.mxu3 %v518_v7 }
 0x19c   : > { %548 = vmatpush.msra.mxu2 %v1047_v40 }
 0x19e   : > { %549 = vmatpush.msra.mxu2 %v1061_v43 }
 0x19f   : > { %v489_v8 = vpop.f32.mrf.mxu3 }
 0x1a0   : > { %550 = vmatpush.msra.mxu2 %v1070_v45  ;;  %v516_v9 = vmul.f32 0.2, %v489_v8  ;;  %vm513_vm6 = vcmp.gt.f32.partialorder %v489_v8, 0.0 }
 0x1a2   : > { %551 = vmatpush.msra.mxu2 %v1079_v47  ;;  %v519_v10 = vsel %vm513_vm6, %v489_v8, %v516_v9 }
 0x1a4   : > { %552 = vmatpush.msra.mxu2 %v1085_v48 }
 0x1a6   : > { %553 = vmatpush.msra.mxu2 %v1094_v49 }
 0x1a8   : > { %554 = vmatpush.msra.mxu2 %v357_v52 }
 0x1aa   : > { %555 = vmatpush.msra.mxu2 %v356_v55 }
 0x1ac   : > { %556 = vmatpush.msra.mxu2 %v355_v56 }
 0x1ae   : > { %557 = vmatpush.msra.mxu2 %v354_v57 }
 0x1b0   : > { %558 = vmatpush.msra.mxu2 %v353_v58 }
 0x1b2   : > { %559 = vmatpush.msra.mxu2 %v352_v59 }
 0x1b3   : > { %560 = vmatmul.f32.vlgmr.msra.gmra.mxu2 %v519_v10 }
 0x20a   : > { %v397_v16 = vpop.f32.mrf.mxu0 }
 0x212   : > { %v417_v27 = vpop.f32.mrf.mxu1 }
 0x213   : > { %v418_v28 = vadd.f32 %v417_v27, %v397_v16 }
 0x216   : > { %v437_v11 = vpop.f32.mrf.mxu2 }
 0x217   : > { %v438_v29 = vadd.f32 %v437_v11, %v418_v28 }
 0x219   : > { %v440_v30 = vadd.f32 %v438_v29, %v931_v13 }
 0x21b   : > { %v444_v31 = vadd.f32 %v731_v22, %v440_v30 }
 0x21d   : > { %v446_v32 = vmul.f32 0.2, %v444_v31  ;;  %vm445_vm9 = vcmp.gt.f32.partialorder %v444_v31, 0.0 }
 0x21e   : > { %v509_v12 = vpop.f32.mrf.mxu2  ;;  %v541_v18 = vpop.f32.mrf.mxu3 }
 0x21f   : > { %vm514_vm7 = vcmp.gt.f32.partialorder %v509_v12, 0.0  ;;  %v517_v14 = vmul.f32 0.2, %v509_v12  ;;  %v447_v33 = vsel %vm445_vm9, %v444_v31, %v446_v32 }
 0x221   : > { %v520_v15 = vsel %vm514_vm7, %v509_v12, %v517_v14 }
 0x222   : > { %684 = vmatmul.msk.f32.vlgmr.msra.gmra.mxu0 %vm376_vm3, %v520_v15 }
 0x236   : > { %v561_v17 = vpop.f32.mrf.mxu2 }
 0x237   : > { %v562_v19 = vadd.f32 %v561_v17, %v541_v18 }
 0x29f   : > { %v581_v20 = vpop.f32.mrf.mxu0 }
 0x2a0   : > { %v582_v21 = vadd.f32 %v581_v20, %v562_v19 }
 0x2a2   : > { %v584_v23 = vadd.f32 %v582_v21, %v931_v13 }
 0x2a4   : > { %v585_v24 = vadd.f32 %v731_v22, %v584_v23 }
 0x2a6   : > { %vm586_vm8 = vcmp.gt.f32.partialorder %v585_v24, 0.0  ;;  %v587_v25 = vmul.f32 0.2, %v585_v24 }
 0x2a8   : > { %v588_v26 = vsel %vm586_vm8, %v585_v24, %v587_v25 }
 0x2a9   : > { %590 = vrot.lane.b32.xlu1 %v588_v26, %s798_s14 }
 0x31b   : > { %v591_v34 = vpop.permute.xlu1 %590 }
 0x31c   : > { %v593_v13 = vsel %vm225_vm0, %v447_v33, %v591_v34 }
 0x31d   : > { %594 = vst.msk [vmem:[%s215_s30] sm:$0xff] %vm376_vm3, %v593_v13 }
 0x31e   : > { %759 = shalt.err (!%p756_p3)
}
 0x31f   : > { %689 = dma.vmem_to_hbm [thread:$0]  (%p867_p5), %s609_s6, 128, %s611_s7, %s596_s22  }
 0x320 PF: > { %p695_p4 = scmp.ge.s32.totalorder %s794_s21, 2  ;;  %s622_s15 = sand.u32 1, %s782_s18  }
 0x321   : > { %s623_s16 = scalar_lea.sflag [#allocation3], %s622_s15 }
 0x322   : > { %p692_p7 = pnand %p695_p4, %p871_p6 }
 0x324   : > { %p693_p8 = pneg %p692_p7 }
 0x326   : > { %777 = dma.done.wait (%p693_p8), %s623_s16, 128  }
 0x327   : > { %779 = vsyncadd (%p693_p8), %s623_s16, 4294967168  ;;  %p15_p9 = scmp.ge.s32.totalorder %s854_s24, 4   ;;  %s1199_s18 = smov %s786_s19 }
 0x328   : > { %s1200_s19 = smov %s790_s20  ;;  %s1201_s20 = smov %s865_s27 }
 0x329   : > { %s1202_s21 = smov %s854_s24  ;;  %17 = sbr.rel (!%p15_p9) target bundleno = 3 (0x3), region = 75 }
 0x32e   :  { %629 = vsyncpa [#allocation3], 1 }
 0x32f   :  { %631 = vsyncpa [#allocation3 + $0x1], 1 }

</bundles_post_ra>
